<compile_context>
chip_gen: v5e
topology: v5e:2x2
jax: 0.10.0
libtpu: 0.0.40
codegen_flags: <defaults>
</compile_context>

<pallas_src>
import math

import jax
import jax.numpy as jnp
from jax.experimental import pallas as pl
from jax.experimental.pallas import tpu as pltpu

_TARGET_BLOCK_BYTES = 4 * 1024 * 1024   # per x block (row-wise path)
_VMEM_BUDGET_BYTES = 24 * 1024 * 1024   # double-buffered x + out + gamma
_VMEM_LIMIT_BYTES = 32 * 1024 * 1024


def _scale_kernel(x_ref, g_ref, o_ref):
    # g_ref is (Rb, 1) (per-row scale) or (Rb, L) (lane pattern); both broadcast.
    o_ref[...] = (x_ref[...].astype(jnp.float32) * g_ref[...]).astype(o_ref.dtype)


def _round_up(v, m):
    return ((v + m - 1) // m) * m


def _sublane(itemsize):
    return {4: 8, 2: 16, 1: 32}.get(itemsize, 8)


def _layerscale_rowwise(x, g_c, N, C, HW, itemsize, sub):
    """(N*C, HW) layout with a (rows, 1) per-row scale.

    Used when HW is already a multiple of 128 (lane-dense) or when channel
    folding is not applicable.
    """
    rows = N * C
    x2 = x.reshape(rows, HW)
    g = jnp.broadcast_to(g_c[None, :], (N, C)).reshape(rows, 1)  # f32 per-row scale

    # Lane tile: up to 8 KiB of lanes per row (2048 f32 / 4096 bf16 / 8192 int8).
    lane_cap = max(128, (8 * 1024) // itemsize)
    HWb = min(_round_up(HW, 128), lane_cap)
    # Row tile: fill the ~4 MiB block target.
    max_rb = max(sub, (_TARGET_BLOCK_BYTES // (HWb * itemsize)) // sub * sub)
    Rb = min(_round_up(rows, sub), max_rb)

    # Keep >= 2 blocks so both v7x TensorCores get work when the problem isn't tiny.
    if (pl.cdiv(rows, Rb) * pl.cdiv(HW, HWb) == 1
            and rows * HW * itemsize > (1 << 20)):
        if Rb >= 2 * sub:
            Rb = max(sub, (Rb // 2) // sub * sub)
        elif HWb >= 256:
            HWb = max(128, (HWb // 2) // 128 * 128)

    grid = (pl.cdiv(rows, Rb), pl.cdiv(HW, HWb))
    out = pl.pallas_call(
        _scale_kernel,
        out_shape=jax.ShapeDtypeStruct((rows, HW), x.dtype),
        grid_spec=pl.GridSpec(
            grid=grid,
            in_specs=[
                pl.BlockSpec((Rb, HWb), lambda i, j: (i, j)),
                pl.BlockSpec((Rb, 1), lambda i, j: (i, 0)),
            ],
            out_specs=pl.BlockSpec((Rb, HWb), lambda i, j: (i, j)),
        ),
        compiler_params=pltpu.CompilerParams(
            dimension_semantics=("parallel", "parallel"),
            vmem_limit_bytes=_VMEM_LIMIT_BYTES,
        ),
    )(x2, g)
    return out.reshape(x.shape)


def _layerscale_folded(x, g_c, N, C, HW, k, itemsize, sub):
    """Fold k whole channels per lane-row so the lane axis k*HW is a multiple of
    128 (no lane padding / masked stores when HW % 128 != 0).

    Gamma is a small periodic lane-pattern block with a constant index_map, so
    it is fetched once and stays resident in VMEM across the whole grid.
    """
    L = k * HW
    R = (N * C) // k
    P = C // k                                    # gamma pattern period (rows)
    row_quant = (P * sub) // math.gcd(P, sub)     # lcm(P, sub)

    # Size the row tile from the double-buffered VMEM budget (x + out + f32 gamma).
    per_row_bytes = 2 * L * (2 * itemsize + 4)
    Rb = max(row_quant,
             (_VMEM_BUDGET_BYTES // per_row_bytes) // row_quant * row_quant)
    if Rb >= R:
        if R > row_quant and R * L * itemsize > (1 << 20):
            # Split so both v7x TensorCores get a block.
            Rb = max(row_quant, (R // 2) // row_quant * row_quant)
        else:
            Rb = R                                # single full-extent row block

    x2 = x.reshape(R, L)
    # Lane pattern: folded row r holds channels (r % P)*k .. (r % P)*k + k-1,
    # each occupying HW consecutive lanes.  Rb is a multiple of P (or == R,
    # itself a multiple of P), so every block uses the same (Rb, L) pattern.
    g_pat = jnp.repeat(g_c.reshape(P, k), HW, axis=1)        # (P, k*HW) f32
    g_blk = jnp.tile(g_pat, (Rb // P, 1))                    # (Rb, L)  f32

    grid = (pl.cdiv(R, Rb),)
    out = pl.pallas_call(
        _scale_kernel,
        out_shape=jax.ShapeDtypeStruct((R, L), x.dtype),
        grid_spec=pl.GridSpec(
            grid=grid,
            in_specs=[
                pl.BlockSpec((Rb, L), lambda i: (i, 0)),
                pl.BlockSpec((Rb, L), lambda i: (0, 0)),     # constant -> resident
            ],
            out_specs=pl.BlockSpec((Rb, L), lambda i: (i, 0)),
        ),
        compiler_params=pltpu.CompilerParams(
            dimension_semantics=("parallel",),
            vmem_limit_bytes=_VMEM_LIMIT_BYTES,
        ),
    )(x2, g_blk)
    return out.reshape(x.shape)


def _layerscale2d_impl(x, gamma):
    """x: (N, C, H, W), gamma: (1, C, 1, 1) -> x * gamma (LayerScale2D.forward)."""
    N, C, H, W = x.shape
    HW = H * W
    itemsize = jnp.dtype(x.dtype).itemsize
    sub = _sublane(itemsize)
    g_c = gamma.reshape(C).astype(jnp.float32)    # scale held/applied in f32

    k = 128 // math.gcd(HW, 128)                  # channels per folded lane-row
    if k > 1 and C % k == 0:
        L = k * HW
        R = (N * C) // k
        P = C // k
        row_quant = (P * sub) // math.gcd(P, sub)
        per_row_bytes = 2 * L * (2 * itemsize + 4)
        if min(row_quant, R) * per_row_bytes <= _VMEM_BUDGET_BYTES:
            return _layerscale_folded(x, g_c, N, C, HW, k, itemsize, sub)
    return _layerscale_rowwise(x, g_c, N, C, HW, itemsize, sub)


layerscale2d = jax.jit(_layerscale2d_impl)


if __name__ == "__main__":
    key = jax.random.PRNGKey(0)
    init_values = 1e-5

    # Case 1: HW multiple of 128 -> lane-dense row-wise path.
    N, C, H, W = 2, 4, 16, 16
    x = jax.random.normal(key, (N, C, H, W), dtype=jnp.float32)
    gamma = init_values * jnp.ones((1, C, 1, 1), dtype=jnp.float32)
    y = jax.block_until_ready(layerscale2d(x, gamma))
    assert y.shape == (N, C, H, W)
    assert jnp.allclose(y, x * gamma, atol=1e-6, rtol=1e-6)

    # Case 2: HW = 14*14 = 196 (not a multiple of 128) -> channel-folded path
    # (k = 32 channels folded per lane-row, lane width 6272 = 49 * 128).
    N2, C2, H2, W2 = 2, 32, 14, 14
    key2 = jax.random.fold_in(key, 1)
    x2 = jax.random.normal(key2, (N2, C2, H2, W2), dtype=jnp.float32)
    gamma2 = init_values * jnp.ones((1, C2, 1, 1), dtype=jnp.float32)
    y2 = jax.block_until_ready(layerscale2d(x2, gamma2))
    assert y2.shape == (N2, C2, H2, W2)
    assert jnp.allclose(y2, x2 * gamma2, atol=1e-6, rtol=1e-6)

    print("KERNEL_OK")
</pallas_src>

<mosaic_0001>
module attributes {stable_mosaic.version = 11 : i64} {
  func.func @_scale_kernel(%arg0: i32, %arg1: i32, %arg2: memref<8x256xf32, #tpu.memory_space<vmem>>, %arg3: memref<8x1xf32, #tpu.memory_space<vmem>>, %arg4: memref<8x256xf32, #tpu.memory_space<vmem>>) attributes {dimension_semantics = [#tpu.dimension_semantics<parallel>, #tpu.dimension_semantics<parallel>], iteration_bounds = array<i64: 1, 1>, scalar_prefetch = 0 : i64, scratch_operands = 0 : i64, tpu.core_type = #tpu.core_type<tc>, window_params = [{transform_indices = @transform_0, window_bounds = array<i64: 8, 256>}, {transform_indices = @transform_1, window_bounds = array<i64: 8, 1>}, {transform_indices = @transform_2, window_bounds = array<i64: 8, 256>}]} {
    %c0 = arith.constant 0 : index
    %c0_0 = arith.constant 0 : index
    %0 = vector.load %arg2[%c0, %c0_0] : memref<8x256xf32, #tpu.memory_space<vmem>>, vector<8x256xf32>
    %c0_1 = arith.constant 0 : index
    %c0_2 = arith.constant 0 : index
    %1 = vector.load %arg3[%c0_1, %c0_2] : memref<8x1xf32, #tpu.memory_space<vmem>>, vector<8x1xf32>
    %2 = vector.broadcast %1 : vector<8x1xf32> to vector<8x256xf32>
    %3 = arith.mulf %0, %2 : vector<8x256xf32>
    %c0_3 = arith.constant 0 : index
    %c0_4 = arith.constant 0 : index
    %4 = vector.load %arg4[%c0_3, %c0_4] : memref<8x256xf32, #tpu.memory_space<vmem>>, vector<8x256xf32>
    tpu.vector_store %arg4[%c0_3, %c0_4], %3 {strides = array<i32>} : memref<8x256xf32, #tpu.memory_space<vmem>>, vector<8x256xf32>,
    return
  }
  func.func @transform_0(%arg0: i32, %arg1: i32) -> (i32, i32) {
    %c0_i32 = arith.constant 0 : i32
    return %arg0, %arg1 : i32, i32
  }
  func.func @transform_1(%arg0: i32, %arg1: i32) -> (i32, i32) {
    %c0_i32 = arith.constant 0 : i32
    %c0_i32_0 = arith.constant 0 : i32
    return %arg0, %c0_i32 : i32, i32
  }
  func.func @transform_2(%arg0: i32, %arg1: i32) -> (i32, i32) {
    %c0_i32 = arith.constant 0 : i32
    return %arg0, %arg1 : i32, i32
  }
}

</mosaic_0001>

<bundles_post_ra>
// kernel: _layerscale2d_impl.1
= control target key start
LH: loop header
LB: loop body
LE: loop exit
PB: predicated region body
PF: predicated region fallthrough
CT: control target
= control target key end

     0   :  { %v29_v0 = vmov 0   ;;  %s60_s1 = inlined_call_operand.vmem [shape: f32[8,1], index: 1, kind: input, shape index: {}]   ;;  %s61_s0 = inlined_call_operand.vmem [shape: f32[8,256], index: 0, kind: input, shape index: {}]   ;;  %s62_s2 = inlined_call_operand.vmem [shape: f32[8,256], index: 2, kind: output, shape index: {}]  }
   0x1   :  { %28 = vset.pattern.permute.xlu0 %v29_v0  ;;  %v13_v1 = vld [vmem:[%s60_s1] sm:$0xff]  ;;  %v12_v3 = vld [vmem:[%s61_s0 + $0x8] sm:$0xff] }
   0x2   :  { %16 = vperm.xlu0 %28, %v13_v1   ;;  %v11_v2 = vld [vmem:[%s61_s0] sm:$0xff] }
  0x74   :  { %v17_v4 = vpop.permute.xlu0 %16 }
  0x75   :  { %v19_v5 = vmul.f32 %v17_v4, %v11_v2  ;;  %v20_v6 = vmul.f32 %v17_v4, %v12_v3 }
  0x77   :  { %21 = vst [vmem:[%s62_s2] sm:$0xff] %v19_v5 }
  0x78   :  { %22 = vst [vmem:[%s62_s2 + $0x8] sm:$0xff] %v20_v6 }

</bundles_post_ra>
